<compile_context>
chip_gen: v7x
topology: tpu7x:2x2x1
jax: 0.10.0
libtpu: 0.0.40
codegen_flags: <defaults>
</compile_context>

<pallas_src>
import functools

import jax
import jax.numpy as jnp
from jax.experimental import pallas as pl
from jax.experimental.pallas import tpu as pltpu


_VMEM_BUDGET = 32 * 1024 * 1024  # per-kernel VMEM target; safe on v5e/v6e/v7x


def _patch_embed_kernel(x_ref, w_ref, b_ref, o_ref, *, precision):
    # x_ref: (tm, K)  patch tile (compute dtype)
    # w_ref: (K, tn)  flattened conv weight tile (resident when tn == Ep)
    # b_ref: (1, tn)  bias tile
    # o_ref: (tm, tn) output tile
    acc = jnp.dot(x_ref[...], w_ref[...],
                  preferred_element_type=jnp.float32, precision=precision)
    o_ref[...] = (acc + b_ref[...].astype(jnp.float32)).astype(o_ref.dtype)


def _round_up(x, m):
    return (x + m - 1) // m * m


def _sublane(dtype):
    """Minimum second-to-last tile dim: 8 (f32), 16 (bf16), 32 (int8/fp8)."""
    return max(8, 32 // jnp.dtype(dtype).itemsize)


def _choose_tiles(M, K, Ep, in_bytes, out_bytes, sub):
    """Pick (tm, tn, vmem_need_bytes)."""
    # Resident-weight path: keep the whole (K, Ep) weight in VMEM when it fits
    # in half the budget (counted x2 for double buffering); otherwise stream
    # 128-wide E tiles (essentially never hit at patch-embed sizes).
    if 2 * K * Ep * in_bytes <= _VMEM_BUDGET // 2:
        tn = Ep
    else:
        tn = 128
    fixed_bytes = 2 * K * tn * in_bytes + 2 * Ep * in_bytes  # weight + bias

    # Row tile: target 512 rows, rounded to sublane packing, but keep >=2 grid
    # steps so the parallel M axis shards across v7x's two TensorCores.
    tm = min(512, _round_up(M, sub))
    if M > sub:
        tm = min(tm, _round_up(pl.cdiv(M, 2), sub))

    def vmem_need(t):
        return fixed_bytes + 2 * t * K * in_bytes + 2 * t * tn * out_bytes

    while tm > sub and vmem_need(tm) > _VMEM_BUDGET:
        tm = max(sub, _round_up(tm // 2, sub))
    return tm, tn, vmem_need(tm)


def patch_embed_forward(x_nchw, weight, bias, patch_size, *,
                        compute_dtype=None, out_dtype=None, precision=None,
                        tm=None):
    """PatchEmbed forward.

    x_nchw : (B, C, H, W)
    weight : (E, C, p, p)   conv weight (PyTorch layout)
    bias   : (E,)           conv bias
    returns: (B, (H//p)*(W//p), E)

    compute_dtype defaults to weight.dtype (f32 params reproduce the module's
    f32 conv); pass jnp.bfloat16 to halve HBM bytes on inference paths (changes
    numerics).  precision=jax.lax.Precision.HIGHEST gives full-f32 MXU passes.
    """
    p = int(patch_size)
    B, C, H, W = x_nchw.shape
    E = weight.shape[0]
    if H % p != 0 or W % p != 0:
        raise ValueError("strict_img_size: H and W must be divisible by patch size")
    Gh, Gw = H // p, W // p
    N = Gh * Gw
    K = C * p * p
    M = B * N

    compute_dtype = weight.dtype if compute_dtype is None else jnp.dtype(compute_dtype)
    out_dtype = weight.dtype if out_dtype is None else jnp.dtype(out_dtype)
    in_bytes = jnp.dtype(compute_dtype).itemsize
    out_bytes = jnp.dtype(out_dtype).itemsize
    sub = max(_sublane(compute_dtype), _sublane(out_dtype))

    # Patch extraction (im2col for a stride-p conv); per-patch feature order is
    # (c, ph, pw) to match the flattened conv weight.  No K padding: the kernel
    # blocks carry the full (small) K as their last dim.
    x = x_nchw.astype(compute_dtype)
    x = x.reshape(B, C, Gh, p, Gw, p)
    x = jnp.transpose(x, (0, 2, 4, 1, 3, 5))          # (B, Gh, Gw, C, p, p)
    patches = x.reshape(M, K)                         # (M, K)

    w_mat = weight.astype(compute_dtype).reshape(E, K).T   # (K, E)
    b_mat = bias.astype(compute_dtype).reshape(1, E)        # (1, E)

    # Pad E to a multiple of 128 so output stores stay lane dense (rare case).
    Ep = _round_up(E, 128)
    if Ep != E:
        w_mat = jnp.pad(w_mat, ((0, 0), (0, Ep - E)))
        b_mat = jnp.pad(b_mat, ((0, 0), (0, Ep - E)))

    # Tile sizes + VMEM budget.
    tm_auto, tn, vmem_need = _choose_tiles(M, K, Ep, in_bytes, out_bytes, sub)
    tm = tm_auto if tm is None else tm
    Mp = _round_up(M, tm)
    if Mp != M:
        patches = jnp.pad(patches, ((0, Mp - M), (0, 0)))

    kernel = functools.partial(_patch_embed_kernel, precision=precision)
    vmem_limit = min(max(vmem_need + (4 << 20), 16 << 20), 40 << 20)

    if tn == Ep:
        # Resident-weight path: 1-D grid over M; constant index_map means the
        # (K, Ep) weight and bias are DMA'd exactly once.
        grid = (Mp // tm,)
        in_specs = [
            pl.BlockSpec((tm, K), lambda i: (i, 0)),
            pl.BlockSpec((K, Ep), lambda i: (0, 0)),
            pl.BlockSpec((1, Ep), lambda i: (0, 0)),
        ]
        out_specs = pl.BlockSpec((tm, Ep), lambda i: (i, 0))
        dim_sem = ("parallel",)
    else:
        # Fallback for weights too large for VMEM: stream 128-wide E tiles.
        grid = (Mp // tm, Ep // tn)
        in_specs = [
            pl.BlockSpec((tm, K), lambda i, j: (i, 0)),
            pl.BlockSpec((K, tn), lambda i, j: (0, j)),
            pl.BlockSpec((1, tn), lambda i, j: (0, j)),
        ]
        out_specs = pl.BlockSpec((tm, tn), lambda i, j: (i, j))
        dim_sem = ("parallel", "parallel")

    out = pl.pallas_call(
        kernel,
        out_shape=jax.ShapeDtypeStruct((Mp, Ep), out_dtype),
        grid=grid,
        in_specs=in_specs,
        out_specs=out_specs,
        compiler_params=pltpu.CompilerParams(
            dimension_semantics=dim_sem,
            vmem_limit_bytes=vmem_limit,
            # Let XLA fold the patchify producer into the kernel's input DMA
            # rather than materializing an extra HBM copy of the activations.
            allow_input_fusion=[True, False, False],
        ),
    )(patches, w_mat, b_mat)

    if Mp != M or Ep != E:
        out = out[:M, :E]
    return out.reshape(B, N, E)


def _reference(x_nchw, weight, bias, p):
    """Pure-JAX reference: strided conv == patch matmul."""
    B, C, H, W = x_nchw.shape
    Gh, Gw = H // p, W // p
    x = x_nchw.astype(jnp.float32).reshape(B, C, Gh, p, Gw, p)
    x = jnp.transpose(x, (0, 2, 4, 1, 3, 5)).reshape(B, Gh * Gw, C * p * p)
    w = weight.astype(jnp.float32).reshape(weight.shape[0], -1)
    return jnp.einsum("bnk,ek->bne", x, w) + bias.astype(jnp.float32)[None, None, :]


if __name__ == "__main__":
    # Small shapes consistent with the module: img_size=16, patch_size=2,
    # in_channels=4, embed_dim=256, batch=2.
    B, C, H, W = 2, 4, 16, 16
    P = 2
    E = 256

    key = jax.random.PRNGKey(0)
    kx, kw, kb = jax.random.split(key, 3)
    x = jax.random.normal(kx, (B, C, H, W), dtype=jnp.float32)
    # Deterministic synthetic Conv2d parameters.
    fan_in = C * P * P
    bound = 1.0 / (fan_in ** 0.5)
    weight = jax.random.uniform(kw, (E, C, P, P), jnp.float32, -bound, bound)
    bias = jax.random.uniform(kb, (E,), jnp.float32, -bound, bound)

    fwd = jax.jit(functools.partial(patch_embed_forward, patch_size=P))
    out = jax.block_until_ready(fwd(x, weight, bias))

    ref = _reference(x, weight, bias, P)
    assert out.shape == (B, (H // P) * (W // P), E), out.shape
    assert out.dtype == weight.dtype, out.dtype
    err = float(jnp.max(jnp.abs(out.astype(jnp.float32) - ref)))
    assert jnp.allclose(out.astype(jnp.float32), ref, atol=2e-4, rtol=2e-4), err

    print("KERNEL_OK")
</pallas_src>

<mosaic_0001>
module attributes {stable_mosaic.version = 11 : i64} {
  func.func @_patch_embed_kernel(%arg0: i32, %arg1: memref<64x16xf32, #tpu.memory_space<vmem>>, %arg2: memref<16x256xf32, #tpu.memory_space<vmem>>, %arg3: memref<1x256xf32, #tpu.memory_space<vmem>>, %arg4: memref<64x256xf32, #tpu.memory_space<vmem>>) attributes {dimension_semantics = [#tpu.dimension_semantics<parallel>], iteration_bounds = array<i64: 2>, scalar_prefetch = 0 : i64, scratch_operands = 0 : i64, tpu.core_type = #tpu.core_type<tc>, window_params = [{transform_indices = @transform_0, window_bounds = array<i64: 64, 16>}, {pipeline_mode = #tpu.pipeline_mode<synchronous>, transform_indices = @transform_1, window_bounds = array<i64: 16, 256>}, {pipeline_mode = #tpu.pipeline_mode<synchronous>, transform_indices = @transform_2, window_bounds = array<i64: 1, 256>}, {transform_indices = @transform_3, window_bounds = array<i64: 64, 256>}]} {
    %c0 = arith.constant 0 : index
    %c0_0 = arith.constant 0 : index
    %0 = vector.load %arg1[%c0, %c0_0] : memref<64x16xf32, #tpu.memory_space<vmem>>, vector<64x16xf32>
    %c0_1 = arith.constant 0 : index
    %c0_2 = arith.constant 0 : index
    %1 = vector.load %arg2[%c0_1, %c0_2] : memref<16x256xf32, #tpu.memory_space<vmem>>, vector<16x256xf32>
    %cst = arith.constant dense<0.000000e+00> : vector<64x256xf32>
    %2 = tpu.matmul %0, %1, %cst {dimension_numbers = #tpu.dot_dimension_numbers<[1], [0], [0], [1], [0, 0, 1, 1], [], []>} : vector<64x16xf32>, vector<16x256xf32>, vector<64x256xf32> -> vector<64x256xf32>
    %c0_3 = arith.constant 0 : index
    %c0_4 = arith.constant 0 : index
    %3 = vector.load %arg3[%c0_3, %c0_4] : memref<1x256xf32, #tpu.memory_space<vmem>>, vector<1x256xf32>
    %4 = vector.broadcast %3 : vector<1x256xf32> to vector<64x256xf32>
    %5 = arith.addf %2, %4 : vector<64x256xf32>
    %c0_5 = arith.constant 0 : index
    %c0_6 = arith.constant 0 : index
    %6 = vector.load %arg4[%c0_5, %c0_6] : memref<64x256xf32, #tpu.memory_space<vmem>>, vector<64x256xf32>
    tpu.vector_store %arg4[%c0_5, %c0_6], %5 {strides = array<i32>} : memref<64x256xf32, #tpu.memory_space<vmem>>, vector<64x256xf32>,
    return
  }
  func.func @transform_0(%arg0: i32) -> (i32, i32) {
    %c0_i32 = arith.constant 0 : i32
    %c0_i32_0 = arith.constant 0 : i32
    return %arg0, %c0_i32 : i32, i32
  }
  func.func @transform_1(%arg0: i32) -> (i32, i32) {
    %c0_i32 = arith.constant 0 : i32
    %c0_i32_0 = arith.constant 0 : i32
    %c0_i32_1 = arith.constant 0 : i32
    return %c0_i32, %c0_i32_0 : i32, i32
  }
  func.func @transform_2(%arg0: i32) -> (i32, i32) {
    %c0_i32 = arith.constant 0 : i32
    %c0_i32_0 = arith.constant 0 : i32
    %c0_i32_1 = arith.constant 0 : i32
    return %c0_i32, %c0_i32_0 : i32, i32
  }
  func.func @transform_3(%arg0: i32) -> (i32, i32) {
    %c0_i32 = arith.constant 0 : i32
    %c0_i32_0 = arith.constant 0 : i32
    return %arg0, %c0_i32 : i32, i32
  }
}

</mosaic_0001>

<bundles_post_ra>
// kernel: patch_embed_forward.1
= control target key start
LH: loop header
LB: loop body
LE: loop exit
PB: predicated region body
PF: predicated region fallthrough
CT: control target
= control target key end

     0   :  { %8 = vsyncpa [#allocation3], 0  ;;  %s734_s0 = inlined_call_operand.vmem [shape: f32[128,16], index: 0, kind: input, shape index: {}]   ;;  %s735_s1 = inlined_call_operand.vmem [shape: f32[16,256], index: 1, kind: input, shape index: {}]   ;;  %s736_s2 = inlined_call_operand.vmem [shape: f32[1,256], index: 2, kind: input, shape index: {}]   ;;  %s737_s3 = inlined_call_operand.hbm [shape: f32[128,256], index: 3, kind: output, shape index: {}]  }
   0x1   :  { %10 = vsyncpa [#allocation3 + $0x1], 0  ;;  %s586_s12 = smov 0   ;;  %s588_s13 = smov 0  }
   0x2   :  { %s590_s14 = smov 0   ;;  %s592_s15 = smov 0  }
   0x3 LB: > { %s607_s16 = sadd.s32 4294967295, %s560_s15   ;;  %s427_s17 = sadd.s32 4294967294, %s560_s15   ;;  %s560_s15 = sphi %s592_s15, %s743_s15   ;;  %s556_s14 = sphi %s590_s14, %s742_s14   ;;  %s552_s13 = sphi %s588_s13, %s741_s13   ;;  %s548_s12 = sphi %s586_s12, %s740_s12  }
   0x4   : > { %s611_s18 = sadd.s32 1, %s560_s15   ;;  %s91_s19 = sadd.s32 1, %s556_s14 }
   0x5   : > { %s88_s20 = ssub.s32 %s560_s15, %s611_s18  ;;  %p101_p0 = scmp.ne.s32.totalorder %s556_s14, %s552_s13 }
   0x6   : > { %p89_p1 = scmp.eq.s32.totalorder %s88_s20, 0  ;;  %p102_p2 = scmp.eq.s32.totalorder %s607_s16, 1 }
   0x7   : > { %p107_p3 = scmp.ne.s32.totalorder %s552_s13, %s548_s12  ;;  %p108_p4 = scmp.eq.s32.totalorder %s427_s17, 1 }
   0x8   : > { %s622_s21 = scalar_select %p89_p1, %s556_s14, %s91_s19  }
   0x9   : > { %p624_p5 = por %p102_p2, %p101_p0  ;;  %p628_p6 = por %p108_p4, %p107_p3 }
   0xa   : > { %p430_p7 = scmp.ge.s32.totalorder %s560_s15, 1  ;;  %p141_p8 = scmp.lt.s32.totalorder %s560_s15, 3 }
   0xc   : > { %p142_p9 = pnand %p430_p7, %p141_p8 }
   0xd   : > { %v181_v0 = vld [vmem:[%s735_s1 + $0x8] sm:$0xff] (!%p142_p9)  ;;  %v183_v1 = vld [vmem:[%s735_s1 + $0x18] sm:$0xff] (!%p142_p9)  ;;  %v180_v2 = vld [vmem:[%s735_s1] sm:$0xff] (!%p142_p9)  ;;  %s432_s30 = sshll.u32 (!%p142_p9), %s607_s16, 3  ;;  %v562_v5 = vmov (!%p142_p9), 0.0   ;;  %vm196_vm0 = vcmask (!%p142_p9), 130048   ;;  %v186_v15 = vlaneseq (!%p142_p9) }
   0xe   : > { %145 = sbr.rel (%p142_p9) target bundleno = 268 (0x10c), region = 32  ;;  %v450_v3 = vpack.c.bf16 (!%p142_p9), %v183_v1, %v181_v0  ;;  %v182_v4 = vld [vmem:[%s735_s1 + $0x10] sm:$0xff] (!%p142_p9)  ;;  %285 = vmatprep.mubr.f32.mxu0 (!%p142_p9), %v562_v5  ;;  %309 = vmatprep.mubr.f32.mxu1 (!%p142_p9), %v562_v5  ;;  %p166_p10 = scmp.lt.s32.totalorder (!%p142_p9), %s432_s30, 15  ;;  %v184_v18 = vld [vmem:[%s736_s2] sm:$0x3] (!%p142_p9) }
   0xf   : > { %v452_v6 = vpack.c.bf16 (!%p142_p9), %v182_v4, %v180_v2  ;;  %v187_v16 = vshrl.u32 (!%p142_p9), %v186_v15, 7  ;;  %s162_s10 = sand.u32 (!%p142_p9), 1, %s552_s13   ;;  %s449_s24 = sshll.u32 (!%p142_p9), %s607_s16, 11 }
  0x10   : > { %451 = vmatprep.subr.bf16.mxu0 (!%p142_p9), %v450_v3  ;;  %454 = vmatprep.subr.bf16.mxu1 (!%p142_p9), %v450_v3  ;;  %s431_s19 = sshll.u32 (!%p142_p9), %s162_s10, 7  ;;  %s683_s16 = scalar_lea.hbm (!%p142_p9), %s737_s3, %s449_s24 }
  0x11   : > { %453 = vmatpush1.bf16.msra.mxu0 (!%p142_p9), %v452_v6  ;;  %455 = vmatpush1.bf16.msra.mxu1 (!%p142_p9), %v452_v6  ;;  %v188_v17 = vsub.s32 (!%p142_p9), 0, %v187_v16  ;;  %v192_v19 = vsub.s32 (!%p142_p9), 1, %v187_v16  ;;  %s664_s20 = scalar_lea.vmem (!%p142_p9), [#allocation2], %s431_s19  ;;  %s693_s28 = scalar_lea.sflag (!%p142_p9), [#allocation3], %s162_s10 }
  0x12   : > { %s365_s25 = sshll.u32 (!%p142_p9), %s664_s20, 4  ;;  %s685_s25 = int_to_ptr.vmem [resolvable:$true] %s365_s25 }
  0x13   : > { %v189_v20 = vrot.slane (!%p142_p9), %v184_v18, %v188_v17  ;;  %v193_v21 = vrot.slane (!%p142_p9), %v184_v18, %v192_v19  ;;  %s498_s29 = scalar_lea.vmem (!%p142_p9), %s685_s25, 2048 }
  0x14   : > { %p499_p11 = scmp.ne.s32.totalorder (!%p142_p9), %s685_s25, %s498_s29 }
  0x15   : > { %s745_s30 = smov (!%p166_p10, %s432_s30), 15 }
  0x16   : > { %s433_s6 = sshll.u32 %s745_s30, 3  ;;  %p500_p12 = pnand %p499_p11, %p624_p5 }
  0x17   : > { %s169_s9 = scalar_lea.vmem %s734_s0, %s433_s6  ;;  %s563_s30 = smov [#allocation2]  }
  0x18   : > { %v172_v7 = vld [vmem:[%s169_s9] sm:$0xff]  ;;  %v173_v9 = vld [vmem:[%s169_s9 + $0x8] sm:$0xff]  ;;  %v174_v11 = vld [vmem:[%s169_s9 + $0x10] sm:$0xff]  ;;  %p501_p13 = pneg %p500_p12  ;;  %s502_s4 = sshll.u32 %s563_s30, 4  ;;  %s503_s4 = int_to_ptr.vmem [resolvable:$false] %s502_s4 }
  0x19   : > { %v176_v8 = vld [vmem:[%s169_s9 + $0x20] sm:$0xff]  ;;  %434 = vmatmul.mubr.msk.f32.vlgmr.msra.gmra.mrb[0].mxu0 %vm196_vm0, %v172_v7  ;;  %v177_v10 = vld [vmem:[%s169_s9 + $0x28] sm:$0xff]  ;;  %v178_v12 = vld [vmem:[%s169_s9 + $0x30] sm:$0xff]  ;;  %s504_s5 = scalar_lea.vmem %s503_s4, 4096  ;;  %p505_p0 = scmp.lt.s32.totalorder %s685_s25, %s503_s4 }
  0x1a   : > { %438 = vmatmul.mubr.msk.f32.vlgmr.msra.gmra.mrb[0].mxu1 %vm196_vm0, %v176_v8  ;;  %291 = vmatprep.mubr.f32.mxu0 %v562_v5  ;;  %v175_v13 = vld [vmem:[%s169_s9 + $0x18] sm:$0xff]  ;;  %p506_p1 = scmp.lt.s32.totalorder %s504_s5, %s498_s29 }
  0x1b   : > { %315 = vmatprep.mubr.f32.mxu1 %v562_v5  ;;  %v179_v14 = vld [vmem:[%s169_s9 + $0x38] sm:$0xff] }
  0x1c   : > { %p507_p2 = por %p506_p1, %p505_p0 }
  0x1d   : > { %435 = vmatmul.mubr.msk.f32.gmra.mrb[2].mxu0 %vm196_vm0, %v173_v9 }
  0x1e   : > { %439 = vmatmul.mubr.msk.f32.gmra.mrb[2].mxu1 %vm196_vm0, %v177_v10  ;;  %297 = vmatprep.mubr.f32.mxu0 %v562_v5  ;;  %p508_p3 = pnand %p507_p2, %p501_p13 }
  0x1f   : > { %321 = vmatprep.mubr.f32.mxu1 %v562_v5 }
  0x21   : > { %436 = vmatmul.mubr.msk.f32.gmra.mrb[4].mxu0 %vm196_vm0, %v174_v11 }
  0x22   : > { %440 = vmatmul.mubr.msk.f32.gmra.mrb[4].mxu1 %vm196_vm0, %v178_v12  ;;  %303 = vmatprep.mubr.f32.mxu0 %v562_v5 }
  0x23   : > { %327 = vmatprep.mubr.f32.mxu1 %v562_v5 }
  0x25   : > { %437 = vmatmul.mubr.msk.f32.gmra.mrb[6].mxu0 %vm196_vm0, %v175_v13 }
  0x26   : > { %441 = vmatmul.mubr.msk.f32.gmra.mrb[6].mxu1 %vm196_vm0, %v179_v14 }
  0xec   : > { %v287_v22 = vpop.f32.mrb[0].mxu0 }
  0xed   : > { %v311_v23 = vpop.f32.mrb[0].mxu1  ;;  %v288_v24 = vadd.f32 %v287_v22, %v189_v20  ;;  %v289_v26 = vpop.f32.mrb[1].mxu0 }
  0xee   : > { %v312_v25 = vadd.f32 %v311_v23, %v189_v20  ;;  %v313_v27 = vpop.f32.mrb[1].mxu1  ;;  %v290_v28 = vadd.f32 %v289_v26, %v193_v21 }
  0xef   : > { %v314_v29 = vadd.f32 %v313_v27, %v193_v21  ;;  %334 = vst [vmem:[%s664_s20] sm:$0xff] %v288_v24 }
  0xf0   : > { %342 = vst [vmem:[%s664_s20 + $0x40] sm:$0xff] %v312_v25  ;;  %335 = vst [vmem:[%s664_s20 + $0x8] sm:$0xff] %v290_v28  ;;  %v293_v30 = vpop.f32.mrb[2].mxu0 }
  0xf1   : > { %343 = vst [vmem:[%s664_s20 + $0x48] sm:$0xff] %v314_v29  ;;  %v317_v31 = vpop.f32.mrb[2].mxu1  ;;  %v294_v32 = vadd.f32 %v293_v30, %v189_v20  ;;  %v295_v34 = vpop.f32.mrb[3].mxu0 }
  0xf2   : > { %v318_v33 = vadd.f32 %v317_v31, %v189_v20  ;;  %v319_v35 = vpop.f32.mrb[3].mxu1  ;;  %v296_v36 = vadd.f32 %v295_v34, %v193_v21 }
  0xf3   : > { %v320_v37 = vadd.f32 %v319_v35, %v193_v21  ;;  %336 = vst [vmem:[%s664_s20 + $0x10] sm:$0xff] %v294_v32 }
  0xf4   : > { %344 = vst [vmem:[%s664_s20 + $0x50] sm:$0xff] %v318_v33  ;;  %337 = vst [vmem:[%s664_s20 + $0x18] sm:$0xff] %v296_v36  ;;  %v299_v38 = vpop.f32.mrb[4].mxu0 }
  0xf5   : > { %345 = vst [vmem:[%s664_s20 + $0x58] sm:$0xff] %v320_v37  ;;  %v323_v39 = vpop.f32.mrb[4].mxu1  ;;  %v300_v40 = vadd.f32 %v299_v38, %v189_v20  ;;  %v301_v42 = vpop.f32.mrb[5].mxu0 }
  0xf6   : > { %v324_v41 = vadd.f32 %v323_v39, %v189_v20  ;;  %v325_v43 = vpop.f32.mrb[5].mxu1  ;;  %v302_v44 = vadd.f32 %v301_v42, %v193_v21 }
  0xf7   : > { %v326_v45 = vadd.f32 %v325_v43, %v193_v21  ;;  %338 = vst [vmem:[%s664_s20 + $0x20] sm:$0xff] %v300_v40 }
  0xf8   : > { %346 = vst [vmem:[%s664_s20 + $0x60] sm:$0xff] %v324_v41  ;;  %339 = vst [vmem:[%s664_s20 + $0x28] sm:$0xff] %v302_v44  ;;  %v305_v46 = vpop.f32.mrb[6].mxu0 }
  0xf9   : > { %347 = vst [vmem:[%s664_s20 + $0x68] sm:$0xff] %v326_v45  ;;  %v329_v47 = vpop.f32.mrb[6].mxu1  ;;  %v306_v48 = vadd.f32 %v305_v46, %v189_v20  ;;  %v307_v50 = vpop.f32.mrb[7].mxu0 }
  0xfa   : > { %v330_v49 = vadd.f32 %v329_v47, %v189_v20  ;;  %v331_v51 = vpop.f32.mrb[7].mxu1  ;;  %v308_v52 = vadd.f32 %v307_v50, %v193_v21 }
  0xfb   : > { %v332_v53 = vadd.f32 %v331_v51, %v193_v21  ;;  %340 = vst [vmem:[%s664_s20 + $0x30] sm:$0xff] %v306_v48 }
  0xfc   : > { %348 = vst [vmem:[%s664_s20 + $0x70] sm:$0xff] %v330_v49  ;;  %341 = vst [vmem:[%s664_s20 + $0x38] sm:$0xff] %v308_v52 }
  0xfd   : > { %349 = vst [vmem:[%s664_s20 + $0x78] sm:$0xff] %v332_v53 }
  0xfe   : > { %511 = shalt.err (!%p508_p3)
}
  0xff   : > { %s512_s6 = scalar_lea.hbm %s683_s16, 2048  ;;  %s516_s9 = scalar_lea.hbm %s737_s3, 4096 }
 0x100   : > { %p513_p4 = scmp.ne.s32.totalorder %s683_s16, %s512_s6  ;;  %p517_p9 = scmp.lt.u32.totalorder %s683_s16, %s737_s3 }
 0x101   : > { %p518_p10 = scmp.lt.u32.totalorder %s516_s9, %s512_s6  ;;  %p520_p12 = scmp.lt.u32.totalorder %s512_s6, %s683_s16 }
 0x102   : > { %p514_p7 = pnand %p513_p4, %p624_p5 }
 0x103   : > { %p519_p11 = por %p518_p10, %p517_p9 }
 0x104   : > { %p515_p8 = pneg %p514_p7 }
 0x105   : > { %p521_p13 = por %p520_p12, %p519_p11 }
 0x107   : > { %p522_p0 = pnand %p521_p13, %p515_p8 }
 0x109   : > { %525 = shalt.err (!%p522_p0)
}
 0x10a   : > { %s564_s17 = smov 256   ;;  %s565_s19 = smov 16  }
 0x10b   : > { %456 = dma.vmem_to_hbm [thread:$0]  (%p624_p5), %s685_s25, 2048, %s683_s16, %s693_s28, %s564_s17, %s564_s17, %s565_s19  }
 0x10c PF: > { %p462_p1 = scmp.ge.s32.totalorder %s560_s15, 2  ;;  %s380_s20 = sand.u32 1, %s548_s12  }
 0x10d   : > { %s381_s24 = scalar_lea.sflag [#allocation3], %s380_s20 }
 0x10e   : > { %p459_p2 = pnand %p462_p1, %p628_p6 }
 0x110   : > { %543 = dma.done.wait (!%p459_p2), %s381_s24, 2048  }
 0x111   : > { %545 = vsyncadd (!%p459_p2), %s381_s24, 4294965248  ;;  %p13_p3 = scmp.ge.s32.totalorder %s611_s18, 4   ;;  %s740_s12 = smov %s552_s13 }
 0x112   : > { %s741_s13 = smov %s556_s14  ;;  %s742_s14 = smov %s622_s21 }
 0x113   : > { %s743_s15 = smov %s611_s18  ;;  %15 = sbr.rel (!%p13_p3) target bundleno = 3 (0x3), region = 67 }
 0x11a   :  { %386 = vsyncpa [#allocation3], 1 }
 0x11b   :  { %388 = vsyncpa [#allocation3 + $0x1], 1 }

</bundles_post_ra>
